<compile_context>
chip_gen: v5e
topology: v5e:2x2
jax: 0.10.0
libtpu: 0.0.40
codegen_flags: <defaults>
</compile_context>

<pallas_src>
import math
import functools

import jax
import jax.numpy as jnp
from jax import lax
from jax.experimental import pallas as pl
from jax.experimental.pallas import tpu as pltpu


# --------------------------------------------------------------------------- #
# PE table construction (plain JAX glue, mirrors the nn.Module __init__)
# --------------------------------------------------------------------------- #
def make_pe_table(d_model, vocab_size=5000):
    """Replicates the buffer built in PositionalEncoding.__init__ -> (vocab, d_model)."""
    position = jnp.arange(vocab_size, dtype=jnp.float32)[:, None]
    div_term = jnp.exp(
        jnp.arange(0, d_model, 2, dtype=jnp.float32) * (-math.log(10000.0) / d_model)
    )
    angles = position * div_term                      # (vocab, d_model // 2)
    pe = jnp.zeros((vocab_size, d_model), jnp.float32)
    pe = pe.at[:, 0::2].set(jnp.sin(angles))
    pe = pe.at[:, 1::2].set(jnp.cos(angles))
    return pe


# --------------------------------------------------------------------------- #
# Kernels
# --------------------------------------------------------------------------- #
def _pe_add_kernel(x_ref, pe_ref, o_ref):
    # x_ref: (B, TS, D), pe_ref: (TS, D).  Add in f32 (the pe buffer is f32,
    # like the torch module's), cast once on store.
    y = x_ref[...].astype(jnp.float32) + pe_ref[...][None, :, :]
    o_ref[...] = y.astype(o_ref.dtype)


def _pe_add_dropout_kernel(seed_ref, x_ref, pe_ref, o_ref, *,
                           seq_len, d_model, ts, keep_threshold, scale):
    y = x_ref[...].astype(jnp.float32) + pe_ref[...][None, :, :]

    # Stateless counter-based PRNG: one 32-bit hash per element, keyed on the
    # global element index and the seed (mixed non-additively so different
    # seeds give decorrelated masks).  Plain VPU integer ops -> lowers both on
    # real TPUs and in interpret mode (pltpu.prng_* has no CPU rule).
    shape = y.shape                                           # (B, TS, D)
    b_idx = lax.broadcasted_iota(jnp.int32, shape, 0)
    s_idx = lax.broadcasted_iota(jnp.int32, shape, 1) + pl.program_id(0) * ts
    d_idx = lax.broadcasted_iota(jnp.int32, shape, 2)
    lin = (b_idx * seq_len + s_idx) * d_model + d_idx         # unique per element

    h = lin.astype(jnp.uint32) ^ (seed_ref[0].astype(jnp.uint32) * jnp.uint32(0x9E3779B9))
    # murmur3-style finalizer (full 32-bit avalanche).
    h = h ^ (h >> jnp.uint32(16))
    h = h * jnp.uint32(0x85EBCA6B)
    h = h ^ (h >> jnp.uint32(13))
    h = h * jnp.uint32(0xC2B2AE35)
    h = h ^ (h >> jnp.uint32(16))

    keep = h >= jnp.uint32(keep_threshold)                    # P(keep) = 1 - p
    o_ref[...] = jnp.where(keep, y * scale, 0.0).astype(o_ref.dtype)


# --------------------------------------------------------------------------- #
# Wrapper
# --------------------------------------------------------------------------- #
def _pick_seq_tile(B, S, D, itemsize, budget_bytes=6 * 1024 * 1024):
    """Sequence-tile length TS: multiple of 8 (full sublane occupancy), sized so
    one x block is ~budget_bytes (amortizes per-grid-step overhead), capped to
    keep >= 2 grid steps when S allows (v7x has two TensorCores)."""
    if S < 8:
        return S                                    # full-extent block (legal)
    max_fit = (S // 8) * 8                          # largest multiple of 8 <= S
    per_row = max(1, B * D * itemsize)
    ts = max(8, (budget_bytes // per_row) // 8 * 8)
    if S >= 16:
        half = max(8, (((S + 1) // 2 + 7) // 8) * 8)
        ts = min(ts, half)                          # >= 2 grid steps when possible
    return min(ts, max_fit)


def positional_encoding(x, pe, *, p=0.1, training=False, seed=0):
    """x: (B, S, D); pe: (vocab, D) float32 table. Returns (B, S, D) in x.dtype."""
    B, S, D = x.shape
    assert pe.shape[1] == D and pe.shape[0] >= S
    pe = pe.astype(jnp.float32)     # no-op for the standard f32 buffer

    if training and p >= 1.0:
        return jnp.zeros_like(x)    # matches torch's all-zeros behavior at p=1

    x_item = jnp.dtype(x.dtype).itemsize
    TS = _pick_seq_tile(B, S, D, x_item)
    grid = (pl.cdiv(S, TS),)

    # Double-buffered x-in, out, pe blocks + 25% headroom.
    need = 2 * (2 * B * TS * D * x_item + TS * D * 4)
    vmem_limit = int(min(max(need + need // 4, 16 * 1024 * 1024), 96 * 1024 * 1024))

    cparams = pltpu.CompilerParams(
        dimension_semantics=("parallel",),
        vmem_limit_bytes=vmem_limit,
    )
    out_shape = jax.ShapeDtypeStruct((B, S, D), x.dtype)

    if training and p > 0.0:
        # TODO(synk): distributionally-correct inverted dropout; cannot reproduce
        # torch's dropout mask bit-for-bit.
        keep_threshold = min(int(round(p * (1 << 32))), (1 << 32) - 1)
        kernel = functools.partial(
            _pe_add_dropout_kernel,
            seq_len=S, d_model=D, ts=TS,
            keep_threshold=keep_threshold,
            scale=1.0 / (1.0 - p),
        )
        out = pl.pallas_call(
            kernel,
            out_shape=out_shape,
            grid_spec=pltpu.PrefetchScalarGridSpec(
                num_scalar_prefetch=1,
                grid=grid,
                in_specs=[
                    pl.BlockSpec((B, TS, D), lambda s, seed_ref: (0, s, 0)),
                    pl.BlockSpec((TS, D), lambda s, seed_ref: (s, 0)),
                ],
                out_specs=pl.BlockSpec((B, TS, D), lambda s, seed_ref: (0, s, 0)),
            ),
            compiler_params=cparams,
        )(jnp.asarray([seed], dtype=jnp.int32), x, pe)
    else:
        out = pl.pallas_call(
            _pe_add_kernel,
            out_shape=out_shape,
            grid=grid,
            in_specs=[
                pl.BlockSpec((B, TS, D), lambda s: (0, s, 0)),
                pl.BlockSpec((TS, D), lambda s: (s, 0)),
            ],
            out_specs=pl.BlockSpec((B, TS, D), lambda s: (0, s, 0)),
            compiler_params=cparams,
        )(x, pe)

    return out


# --------------------------------------------------------------------------- #
# Demo / self-check
# --------------------------------------------------------------------------- #
if __name__ == "__main__":
    key = jax.random.PRNGKey(0)

    B, S, D = 2, 8, 32          # batch=2, seq=8, d_model=32
    VOCAB = 5000                # module default
    P = 0.1

    x = jax.random.normal(key, (B, S, D), dtype=jnp.float32)
    pe = make_pe_table(D, VOCAB)

    # Eval-mode forward (dropout is identity, matching module.eval()).
    out = jax.block_until_ready(positional_encoding(x, pe, p=P, training=False))
    ref = x + pe[None, :S, :]
    assert out.shape == (B, S, D) and out.dtype == x.dtype
    assert jnp.allclose(out, ref, atol=1e-6, rtol=1e-6)

    # Training-mode forward: each element is (approximately) either 0 or ref/(1-p).
    out_tr = jax.block_until_ready(
        positional_encoding(x, pe, p=P, training=True, seed=123)
    )
    scale = 1.0 / (1.0 - P)
    scaled = ref * scale
    is_zero = jnp.abs(out_tr) <= 1e-6
    is_scaled = jnp.abs(out_tr - scaled) <= 1e-4 * (1.0 + jnp.abs(scaled))
    assert bool(jnp.all(is_zero | is_scaled))
    keep_frac = float(jnp.mean(is_scaled.astype(jnp.float32)))
    assert 0.5 <= keep_frac <= 1.0      # loose bound (only 512 elements)

    print("KERNEL_OK")
</pallas_src>

<mosaic_0001>
module attributes {stable_mosaic.version = 11 : i64} {
  func.func @_pe_add_kernel(%arg0: i32, %arg1: memref<2x8x32xf32, #tpu.memory_space<vmem>>, %arg2: memref<8x32xf32, #tpu.memory_space<vmem>>, %arg3: memref<2x8x32xf32, #tpu.memory_space<vmem>>) attributes {dimension_semantics = [#tpu.dimension_semantics<parallel>], iteration_bounds = array<i64: 1>, scalar_prefetch = 0 : i64, scratch_operands = 0 : i64, tpu.core_type = #tpu.core_type<tc>, window_params = [{transform_indices = @transform_0, window_bounds = array<i64: 2, 8, 32>}, {transform_indices = @transform_1, window_bounds = array<i64: 8, 32>}, {transform_indices = @transform_2, window_bounds = array<i64: 2, 8, 32>}]} {
    %c0 = arith.constant 0 : index
    %c0_0 = arith.constant 0 : index
    %c0_1 = arith.constant 0 : index
    %0 = vector.load %arg1[%c0, %c0_0, %c0_1] : memref<2x8x32xf32, #tpu.memory_space<vmem>>, vector<2x8x32xf32>
    %c0_2 = arith.constant 0 : index
    %c0_3 = arith.constant 0 : index
    %1 = vector.load %arg2[%c0_2, %c0_3] : memref<8x32xf32, #tpu.memory_space<vmem>>, vector<8x32xf32>
    %2 = vector.shape_cast %1 : vector<8x32xf32> to vector<1x8x32xf32>
    %3 = vector.broadcast %2 : vector<1x8x32xf32> to vector<2x8x32xf32>
    %4 = arith.addf %0, %3 : vector<2x8x32xf32>
    %c0_4 = arith.constant 0 : index
    %c0_5 = arith.constant 0 : index
    %c0_6 = arith.constant 0 : index
    %5 = vector.load %arg3[%c0_4, %c0_5, %c0_6] : memref<2x8x32xf32, #tpu.memory_space<vmem>>, vector<2x8x32xf32>
    tpu.vector_store %arg3[%c0_4, %c0_5, %c0_6], %4 {strides = array<i32>} : memref<2x8x32xf32, #tpu.memory_space<vmem>>, vector<2x8x32xf32>,
    return
  }
  func.func @transform_0(%arg0: i32) -> (i32, i32, i32) {
    %c0_i32 = arith.constant 0 : i32
    %c0_i32_0 = arith.constant 0 : i32
    %c0_i32_1 = arith.constant 0 : i32
    return %c0_i32, %arg0, %c0_i32_0 : i32, i32, i32
  }
  func.func @transform_1(%arg0: i32) -> (i32, i32) {
    %c0_i32 = arith.constant 0 : i32
    %c0_i32_0 = arith.constant 0 : i32
    return %arg0, %c0_i32 : i32, i32
  }
  func.func @transform_2(%arg0: i32) -> (i32, i32, i32) {
    %c0_i32 = arith.constant 0 : i32
    %c0_i32_0 = arith.constant 0 : i32
    %c0_i32_1 = arith.constant 0 : i32
    return %c0_i32, %arg0, %c0_i32_0 : i32, i32, i32
  }
}

</mosaic_0001>

<bundles_post_ra>
// kernel: tpu_custom_call.1
= control target key start
LH: loop header
LB: loop body
LE: loop exit
PB: predicated region body
PF: predicated region fallthrough
CT: control target
= control target key end

     0   :  { %vm17_vm0 = vcmask 261120   ;;  %s97_s0 = inlined_call_operand.vmem [shape: f32[2,8,32], index: 0, kind: input, shape index: {}]   ;;  %s98_s1 = inlined_call_operand.vmem [shape: f32[5000,32], index: 1, kind: input, shape index: {}]   ;;  %s99_s2 = inlined_call_operand.hbm [shape: f32[2,8,32], index: 2, kind: output, shape index: {}]  }
   0x1   :  { %v12_v0 = vld [vmem:[%s97_s0] sm:$0xff]  ;;  %v13_v2 = vld [vmem:[%s97_s0 + $0x8] sm:$0xff]  ;;  %s26_s17 = sshll.u32 %s99_s2, 4  ;;  %s27_s17 = int_to_ptr.hbm [resolvable:$true] %s26_s17 }
   0x2   :  { %v14_v1 = vld [vmem:[%s98_s1] sm:$0xff] }
   0x3   :  { %v15_v3 = vadd.f32 %v14_v1, %v12_v0  ;;  %v16_v4 = vadd.f32 %v14_v1, %v13_v2 }
   0x4   :  { %7 = vsyncpa [#allocation3], 0  ;;  %s67_s18 = smov [#allocation2]   ;;  %s68_s20 = smov 128  }
   0x5   :  { %s24_s19 = sshll.u32 %s67_s18, 4  ;;  %18 = vst.msk [vmem:[#allocation2] sm:$0xff] %vm17_vm0, %v15_v3  ;;  %s69_s1 = smov 8   ;;  %s25_s19 = int_to_ptr.vmem [resolvable:$true] %s24_s19 }
   0x6   :  { %19 = vst.msk [vmem:[#allocation2 + $0x8] sm:$0xff] %vm17_vm0, %v16_v4 }
   0x7   :  { %32 = dma.vmem_to_hbm [thread:$0]  %s25_s19, 256, %s27_s17, [#allocation3], %s68_s20, %s68_s20, %s69_s1  }
   0x8   :  { %65 = dma.done.wait [#allocation3], 256  }
   0x9   :  { %66 = vsyncadd [#allocation3], 4294967040 }
   0xa   :  { %37 = vsyncpa [#allocation3], 1 }

</bundles_post_ra>
